<compile_context>
chip_gen: v7x
topology: tpu7x:2x2x1
jax: 0.10.0
libtpu: 0.0.40
codegen_flags: <defaults>
</compile_context>

<pallas_src>
import numpy as np
import jax
import jax.numpy as jnp
from jax.experimental import pallas as pl
from jax.experimental.pallas import tpu as pltpu


def _nms_kernel(thr_ref, rep_ref, rel_ref, out_ref):
    """NMS maxima mask for a (TILE_BC, H, W) block.

    thr_ref: (2,) f32 in SMEM -> [rel_thr, rep_thr]
    rep_ref, rel_ref: (TILE_BC, H, W) f32 VMEM blocks
    out_ref: (TILE_BC, H, W) uint8 VMEM block
    """
    tile_bc, H, W = rep_ref.shape
    rel_thr = thr_ref[0]
    rep_thr = thr_ref[1]
    neg_inf = jnp.float32(-jnp.inf)

    # Hoisted edge masks: the cyclic rolls wrap around, and the wrapped
    # entries must read as -inf so the result matches MaxPool2d(3, 1, pad=1).
    col = jax.lax.broadcasted_iota(jnp.int32, (H, W), 1)
    row = jax.lax.broadcasted_iota(jnp.int32, (H, W), 0)
    first_col = col == 0
    last_col = col == W - 1
    first_row = row == 0
    last_row = row == H - 1

    def body(t, carry):
        rep = rep_ref[t]                                   # (H, W)
        rel = rel_ref[t]

        # Horizontal 3-way max along lanes (W).
        left = pltpu.roll(rep, shift=1, axis=1)            # col j-1 value at col j
        right = pltpu.roll(rep, shift=W - 1, axis=1)       # col j+1 value at col j
        left = jnp.where(first_col, neg_inf, left)
        right = jnp.where(last_col, neg_inf, right)
        row_max = jnp.maximum(rep, jnp.maximum(left, right))

        # Vertical 3-way max along sublanes (H).
        up = pltpu.roll(row_max, shift=1, axis=0)          # row i-1 value at row i
        down = pltpu.roll(row_max, shift=H - 1, axis=0)    # row i+1 value at row i
        up = jnp.where(first_row, neg_inf, up)
        down = jnp.where(last_row, neg_inf, down)
        pooled = jnp.maximum(row_max, jnp.maximum(up, down))

        maxima = (rep == pooled) & (rep >= rep_thr) & (rel >= rel_thr)
        out_ref[t] = maxima.astype(jnp.uint8)
        return carry

    jax.lax.fori_loop(0, tile_bc, body, 0)


def _choose_tile_bc(BC, H, W, target_bytes=4 << 20):
    """Largest divisor of BC giving ~target_bytes f32 input tiles, >=2 steps."""
    plane_bytes = H * W * 4
    max_tile = max(1, target_bytes // max(plane_bytes, 1))
    if BC >= 2:
        # Keep at least two grid steps so "parallel" can shard across TCs.
        max_tile = min(max_tile, BC // 2)
    max_tile = max(1, min(max_tile, BC))
    tile = 1
    for d in range(1, max_tile + 1):
        if BC % d == 0:
            tile = d
    return tile


def nms_mask_pallas(reliability, repeatability, rel_thr=0.7, rep_thr=0.7):
    """Compute the maxima mask with a Pallas TPU kernel.

    reliability, repeatability: (B, C, H, W) float tensors.
    Returns (B, C, H, W) uint8 mask (nonzero == maxima), same semantics as the
    PyTorch `maxima` boolean tensor.
    """
    B, C, H, W = repeatability.shape
    BC = B * C
    rep = repeatability.reshape(BC, H, W)
    rel = reliability.reshape(BC, H, W)
    if rep.dtype != jnp.float32:
        rep = rep.astype(jnp.float32)
    if rel.dtype != jnp.float32:
        rel = rel.astype(jnp.float32)

    tile_bc = _choose_tile_bc(BC, H, W)
    grid = (BC // tile_bc,)

    # Runtime thresholds in SMEM -> no recompile when they change.
    thr = jnp.array([rel_thr, rep_thr], dtype=jnp.float32)

    # Note: block last dim == full W, so stores are lane-dense whenever W is
    # reasonably large (real R2D2 image widths); for tiny W the masked stores
    # are irrelevant.
    mask_u8 = pl.pallas_call(
        _nms_kernel,
        out_shape=jax.ShapeDtypeStruct((BC, H, W), jnp.uint8),
        grid_spec=pltpu.PrefetchScalarGridSpec(
            num_scalar_prefetch=0,
            grid=grid,
            in_specs=[
                pl.BlockSpec(memory_space=pltpu.MemorySpace.SMEM),
                pl.BlockSpec((tile_bc, H, W), lambda i: (i, 0, 0)),
                pl.BlockSpec((tile_bc, H, W), lambda i: (i, 0, 0)),
            ],
            out_specs=pl.BlockSpec((tile_bc, H, W), lambda i: (i, 0, 0)),
        ),
        compiler_params=pltpu.CompilerParams(
            dimension_semantics=("parallel",),
            vmem_limit_bytes=40 * 1024 * 1024,
        ),
    )(thr, rep, rel)

    return mask_u8.reshape(B, C, H, W)


def non_max_suppression(reliability_list, repeatability_list,
                        rel_thr=0.7, rep_thr=0.7):
    """Full forward: returns (2, N) int array of (y, x) coords of maxima."""
    assert len(reliability_list) == len(repeatability_list) == 1
    reliability = reliability_list[0]
    repeatability = repeatability_list[0]

    mask_u8 = nms_mask_pallas(reliability, repeatability, rel_thr, rep_thr)

    # TODO(synk): nonzero() has a data-dependent output shape; done on host.
    # TODO(synk): optionally bit-pack the mask in-kernel to cut D2H bytes.
    idx = np.stack(np.nonzero(np.asarray(mask_u8)), axis=0)   # (4, N)
    return idx[2:4]                                            # (y, x)


def _reference_mask(reliability, repeatability, rel_thr=0.7, rep_thr=0.7):
    # Pure-JAX reference (reduce_window == MaxPool2d(3, stride=1, pad=1)).
    pooled = jax.lax.reduce_window(
        repeatability, -jnp.inf, jax.lax.max,
        window_dimensions=(1, 1, 3, 3), window_strides=(1, 1, 1, 1),
        padding=((0, 0), (0, 0), (1, 1), (1, 1)))
    return (repeatability == pooled) & (repeatability >= rep_thr) & \
           (reliability >= rel_thr)


if __name__ == "__main__":
    key = jax.random.PRNGKey(0)
    k1, k2 = jax.random.split(key)
    B, C, H, W = 2, 4, 16, 16
    reliability = jax.random.uniform(k1, (B, C, H, W), dtype=jnp.float32)
    repeatability = jax.random.uniform(k2, (B, C, H, W), dtype=jnp.float32)

    # Kernel mask vs pure-JAX reference mask.
    mask_u8 = nms_mask_pallas(reliability, repeatability)
    jax.block_until_ready(mask_u8)
    ref_mask = np.asarray(_reference_mask(reliability, repeatability))
    assert np.array_equal(np.asarray(mask_u8).astype(bool), ref_mask), \
        "mask mismatch vs reference"

    # Full forward (coords), matches the PyTorch nonzero().t()[2:4] semantics.
    out = non_max_suppression([reliability], [repeatability])
    ref_idx = np.stack(np.nonzero(ref_mask), axis=0)[2:4]
    assert out.shape == ref_idx.shape and np.array_equal(out, ref_idx), \
        f"index mismatch: {out.shape} vs {ref_idx.shape}"

    print("KERNEL_OK")
</pallas_src>

<mosaic_0001>
module attributes {stable_mosaic.version = 11 : i64} {
  func.func @_nms_kernel(%arg0: i32, %arg1: memref<2xf32, #tpu.memory_space<smem>>, %arg2: memref<4x16x16xf32, #tpu.memory_space<vmem>>, %arg3: memref<4x16x16xf32, #tpu.memory_space<vmem>>, %arg4: memref<4x16x16xi8, #tpu.memory_space<vmem>>) attributes {dimension_semantics = [#tpu.dimension_semantics<parallel>], iteration_bounds = array<i64: 2>, scalar_prefetch = 0 : i64, scratch_operands = 0 : i64, tpu.core_type = #tpu.core_type<tc>, window_params = [{transform_indices = @transform_0, window_bounds = array<i64: 2>}, {transform_indices = @transform_1, window_bounds = array<i64: 4, 16, 16>}, {transform_indices = @transform_2, window_bounds = array<i64: 4, 16, 16>}, {transform_indices = @transform_3, window_bounds = array<i64: 4, 16, 16>}]} {
    %c0 = arith.constant 0 : index
    %0 = memref.load %arg1[%c0] : memref<2xf32, #tpu.memory_space<smem>>
    %c1 = arith.constant 1 : index
    %1 = memref.load %arg1[%c1] : memref<2xf32, #tpu.memory_space<smem>>
    %2 = tpu.iota {dimensions = array<i32: 1>} : vector<16x16xi32>
    %3 = tpu.iota {dimensions = array<i32: 0>} : vector<16x16xi32>
    %c0_i32 = arith.constant 0 : i32
    %4 = vector.broadcast %c0_i32 : i32 to vector<16x16xi32>
    %5 = arith.cmpi eq, %2, %4 : vector<16x16xi32>
    %c15_i32 = arith.constant 15 : i32
    %6 = vector.broadcast %c15_i32 : i32 to vector<16x16xi32>
    %7 = arith.cmpi eq, %2, %6 : vector<16x16xi32>
    %c0_i32_0 = arith.constant 0 : i32
    %8 = vector.broadcast %c0_i32_0 : i32 to vector<16x16xi32>
    %9 = arith.cmpi eq, %3, %8 : vector<16x16xi32>
    %c15_i32_1 = arith.constant 15 : i32
    %10 = vector.broadcast %c15_i32_1 : i32 to vector<16x16xi32>
    %11 = arith.cmpi eq, %3, %10 : vector<16x16xi32>
    %cst = arith.constant 0xFF800000 : f32
    %c0_i32_2 = arith.constant 0 : i32
    %c4_i32 = arith.constant 4 : i32
    %12 = arith.addi %c0_i32_2, %c4_i32 : i32
    %c1_i32 = arith.constant 1 : i32
    scf.for %arg5 = %c0_i32_2 to %12 step %c1_i32  : i32 {
      %13 = arith.index_cast %arg5 : i32 to index
      %c0_4 = arith.constant 0 : index
      %c0_5 = arith.constant 0 : index
      %14 = vector.load %arg2[%13, %c0_4, %c0_5] : memref<4x16x16xf32, #tpu.memory_space<vmem>>, vector<1x16x16xf32>
      %15 = vector.shape_cast %14 : vector<1x16x16xf32> to vector<16x16xf32>
      %16 = arith.index_cast %arg5 : i32 to index
      %c0_6 = arith.constant 0 : index
      %c0_7 = arith.constant 0 : index
      %17 = vector.load %arg3[%16, %c0_6, %c0_7] : memref<4x16x16xf32, #tpu.memory_space<vmem>>, vector<1x16x16xf32>
      %18 = vector.shape_cast %17 : vector<1x16x16xf32> to vector<16x16xf32>
      %c1_i32_8 = arith.constant 1 : i32
      %19 = tpu.dynamic_rotate %15 by %c1_i32_8 dim 1 : vector<16x16xf32>, i32 -> vector<16x16xf32>
      %c15_i32_9 = arith.constant 15 : i32
      %20 = tpu.dynamic_rotate %15 by %c15_i32_9 dim 1 : vector<16x16xf32>, i32 -> vector<16x16xf32>
      %21 = vector.broadcast %cst : f32 to vector<16x16xf32>
      %22 = arith.select %5, %21, %19 : vector<16x16xi1>, vector<16x16xf32>
      %23 = vector.broadcast %cst : f32 to vector<16x16xf32>
      %24 = arith.select %7, %23, %20 : vector<16x16xi1>, vector<16x16xf32>
      %25 = arith.maximumf %22, %24 : vector<16x16xf32>
      %26 = arith.maximumf %15, %25 : vector<16x16xf32>
      %c1_i32_10 = arith.constant 1 : i32
      %27 = tpu.dynamic_rotate %26 by %c1_i32_10 dim 0 : vector<16x16xf32>, i32 -> vector<16x16xf32>
      %c15_i32_11 = arith.constant 15 : i32
      %28 = tpu.dynamic_rotate %26 by %c15_i32_11 dim 0 : vector<16x16xf32>, i32 -> vector<16x16xf32>
      %29 = vector.broadcast %cst : f32 to vector<16x16xf32>
      %30 = arith.select %9, %29, %27 : vector<16x16xi1>, vector<16x16xf32>
      %31 = vector.broadcast %cst : f32 to vector<16x16xf32>
      %32 = arith.select %11, %31, %28 : vector<16x16xi1>, vector<16x16xf32>
      %33 = arith.maximumf %30, %32 : vector<16x16xf32>
      %34 = arith.maximumf %26, %33 : vector<16x16xf32>
      %35 = arith.cmpf oeq, %15, %34 : vector<16x16xf32>
      %36 = vector.broadcast %1 : f32 to vector<16x16xf32>
      %37 = arith.cmpf oge, %15, %36 : vector<16x16xf32>
      %38 = arith.andi %35, %37 : vector<16x16xi1>
      %39 = vector.broadcast %0 : f32 to vector<16x16xf32>
      %40 = arith.cmpf oge, %18, %39 : vector<16x16xf32>
      %41 = arith.andi %38, %40 : vector<16x16xi1>
      %42 = arith.extui %41 : vector<16x16xi1> to vector<16x16xi8>
      %43 = arith.index_cast %arg5 : i32 to index
      %c0_12 = arith.constant 0 : index
      %c0_13 = arith.constant 0 : index
      %44 = vector.load %arg4[%43, %c0_12, %c0_13] : memref<4x16x16xi8, #tpu.memory_space<vmem>>, vector<1x16x16xi8>
      %45 = vector.shape_cast %44 : vector<1x16x16xi8> to vector<16x16xi8>
      %46 = vector.shape_cast %42 : vector<16x16xi8> to vector<1x16x16xi8>
      tpu.vector_store %arg4[%43, %c0_12, %c0_13], %46 {strides = array<i32>} : memref<4x16x16xi8, #tpu.memory_space<vmem>>, vector<1x16x16xi8>,
    }
    %c4_i32_3 = arith.constant 4 : i32
    return
  }
  func.func @transform_0(%arg0: i32) -> i32 {
    %c0_i32 = arith.constant 0 : i32
    %c0_i32_0 = arith.constant 0 : i32
    return %c0_i32 : i32
  }
  func.func @transform_1(%arg0: i32) -> (i32, i32, i32) {
    %c0_i32 = arith.constant 0 : i32
    %c0_i32_0 = arith.constant 0 : i32
    %c0_i32_1 = arith.constant 0 : i32
    return %arg0, %c0_i32, %c0_i32_0 : i32, i32, i32
  }
  func.func @transform_2(%arg0: i32) -> (i32, i32, i32) {
    %c0_i32 = arith.constant 0 : i32
    %c0_i32_0 = arith.constant 0 : i32
    %c0_i32_1 = arith.constant 0 : i32
    return %arg0, %c0_i32, %c0_i32_0 : i32, i32, i32
  }
  func.func @transform_3(%arg0: i32) -> (i32, i32, i32) {
    %c0_i32 = arith.constant 0 : i32
    %c0_i32_0 = arith.constant 0 : i32
    %c0_i32_1 = arith.constant 0 : i32
    return %arg0, %c0_i32, %c0_i32_0 : i32, i32, i32
  }
}

</mosaic_0001>

<bundles_post_ra>
// kernel: tpu_custom_call.1
= control target key start
LH: loop header
LB: loop body
LE: loop exit
PB: predicated region body
PF: predicated region fallthrough
CT: control target
= control target key end

     0   :  { %8 = vsyncpa [#allocation5], 0  ;;  %s1090_s0 = inlined_call_operand.hbm [shape: f32[2], index: 0, kind: input, shape index: {}]   ;;  %s1091_s1 = inlined_call_operand.hbm [shape: f32[8,16,16], index: 1, kind: input, shape index: {}]   ;;  %s1092_s2 = inlined_call_operand.hbm [shape: f32[8,16,16], index: 2, kind: input, shape index: {}]   ;;  %s1093_s3 = inlined_call_operand.hbm [shape: u8[8,16,16], index: 3, kind: output, shape index: {}]  }
   0x1   :  { %9 = vsyncpa [#allocation3], 0 }
   0x2   :  { %11 = vsyncpa [#allocation3 + $0x1], 0 }
   0x3   :  { %12 = vsyncpa [#allocation8], 0 }
   0x4   :  { %14 = vsyncpa [#allocation8 + $0x1], 0 }
   0x5   :  { %15 = vsyncpa [#allocation4], 0 }
   0x6   :  { %17 = vsyncpa [#allocation4 + $0x1], 0  ;;  %s789_s12 = smov 0   ;;  %s791_s13 = smov 0  }
   0x7   :  { %s793_s14 = smov 0   ;;  %s795_s15 = smov 0  }
   0x8 LB: > { %s810_s16 = sadd.s32 4294967295, %s751_s15   ;;  %s488_s17 = sadd.s32 4294967294, %s751_s15   ;;  %s751_s15 = sphi %s795_s15, %s1114_s15   ;;  %s747_s14 = sphi %s793_s14, %s1113_s14   ;;  %s743_s13 = sphi %s791_s13, %s1112_s13   ;;  %s739_s12 = sphi %s789_s12, %s1111_s12  }
   0x9   : > { %s814_s18 = sadd.s32 1, %s751_s15   ;;  %s51_s19 = sadd.s32 1, %s747_s14 }
   0xa   : > { %s48_s20 = ssub.s32 %s751_s15, %s814_s18  ;;  %p58_p0 = scmp.ne.s32.totalorder %s747_s14, %s743_s13 }
   0xb   : > { %p49_p1 = scmp.eq.s32.totalorder %s48_s20, 0  ;;  %p59_p2 = scmp.eq.s32.totalorder %s751_s15, 0 }
   0xc   : > { %p64_p3 = scmp.ne.s32.totalorder %s743_s13, %s739_s12  ;;  %p1094_p4 = scmp.eq.s32.totalorder %s810_s16, 0 }
   0xd   : > { %s826_s21 = scalar_select %p49_p1, %s747_s14, %s51_s19  }
   0xe   : > { %p828_p5 = por %p59_p2, %p58_p0  ;;  %p834_p6 = por %p1094_p4, %p64_p3 }
   0xf   : > { %p114_p7 = scmp.eq.s32.totalorder %s810_s16, 1  ;;  %p120_p8 = scmp.eq.s32.totalorder %s488_s17, 1 }
  0x10   : > { %s1098_s23 = scalar_select %p834_p6, 1, 0 }
  0x11   : > { %p489_p9 = scmp.ge.s32.totalorder %s751_s15, 1  ;;  %p127_p10 = scmp.lt.s32.totalorder %s751_s15, 3 }
  0x12   : > { %p841_p11 = por %p114_p7, %p58_p0  ;;  %p845_p12 = por %p120_p8, %p64_p3 }
  0x13   : > { %p849_p13 = pnand %p489_p9, %p127_p10  ;;  %p548_p4 = scmp.lt.s32.totalorder %s751_s15, 2 }
  0x14   : > { %s1099_s24 = scalar_select %p841_p11, 1, 0 }
  0x15   : > { %s1100_s25 = scalar_select %p845_p12, 1, 0 }
  0x16   : > { %p532_p2 = pneg %p849_p13  ;;  %s858_s27 = sand.u32 1, %s747_s14  }
  0x17   : > { %s516_s28 = sshll.u32 %s751_s15, 10  ;;  %p1102_p0 = scmp.eq.s32.totalorder %s810_s16, 0 }
  0x18   : > { %p865_p3 = pnand %p548_p4, %p828_p5  ;;  %s492_s30 = sshll.u32 %s858_s27, 6 }
  0x19   : > { %p533_p7 = pnand %p532_p2, %p1102_p0  ;;  %s600_s6 = scalar_lea.hbm %s1090_s0, 16 }
  0x1a   : > { %p601_p8 = scmp.ne.s32.totalorder %s1090_s0, %s600_s6  ;;  %p607_p2 = scmp.lt.u32.totalorder %s600_s6, %s1090_s0 }
  0x1b   : > { %p602_p9 = pneg %p533_p7 }
  0x1d   : > { %p603_p10 = pnand %p602_p9, %p601_p8 }
  0x1f   : > { %p604_p1 = pneg %p603_p10 }
  0x21   : > { %p609_p4 = pnand %p607_p2, %p604_p1 }
  0x23   : > { %612 = shalt.err (!%p609_p4)
}
  0x24   : > { %s757_s11 = smov [#allocation2]   ;;  %s887_s4 = scalar_lea.hbm %s1091_s1, %s516_s28 }
  0x25   : > { %535 = dma.hbm_to_smem (!%p533_p7), %s1090_s0, 16, %s757_s11, [#allocation5]  }
  0x26   : > { %s153_s5 = scalar_lea.vmem [#allocation6], %s492_s30  ;;  %s150_s7 = scalar_lea.sflag [#allocation3], %s858_s27 }
  0x27   : > { %s161_s6 = sshll.u32 %s153_s5, 4  ;;  %s613_s8 = scalar_lea.hbm %s887_s4, 1024  ;;  %s891_s6 = int_to_ptr.vmem [resolvable:$true] %s161_s6 }
  0x28   : > { %p614_p5 = scmp.ne.s32.totalorder %s887_s4, %s613_s8  ;;  %p615_p1 = pneg %p865_p3 }
  0x29   : > { %s618_s11 = scalar_lea.hbm %s1091_s1, 2048  ;;  %p619_p8 = scmp.lt.u32.totalorder %s887_s4, %s1091_s1 }
  0x2a   : > { %p616_p0 = pnand %p615_p1, %p614_p5  ;;  %p620_p9 = scmp.lt.u32.totalorder %s618_s11, %s613_s8 }
  0x2b   : > { %p622_p2 = scmp.lt.u32.totalorder %s613_s8, %s887_s4 }
  0x2c   : > { %p617_p7 = pneg %p616_p0  ;;  %p621_p10 = por %p620_p9, %p619_p8 }
  0x2e   : > { %p623_p4 = por %p622_p2, %p621_p10 }
  0x30   : > { %p624_p12 = pnand %p623_p4, %p617_p7 }
  0x32   : > { %627 = shalt.err (!%p624_p12)
}
  0x33   : > { %s628_s20 = scalar_lea.vmem %s891_s6, 1024  ;;  %s758_s22 = smov [#allocation6]  }
  0x34   : > { %p629_p5 = scmp.ne.s32.totalorder %s891_s6, %s628_s20  ;;  %s633_s5 = sshll.u32 %s758_s22, 4  ;;  %s634_s5 = int_to_ptr.vmem [resolvable:$false] %s633_s5 }
  0x35   : > { %s635_s9 = scalar_lea.vmem %s634_s5, 2048  ;;  %p636_p6 = scmp.lt.s32.totalorder %s891_s6, %s634_s5 }
  0x36   : > { %p631_p0 = pnand %p629_p5, %p615_p1  ;;  %p637_p8 = scmp.lt.s32.totalorder %s635_s9, %s628_s20 }
  0x38   : > { %p632_p11 = pneg %p631_p0  ;;  %p638_p9 = por %p637_p8, %p636_p6 }
  0x3a   : > { %p639_p10 = pnand %p638_p9, %p632_p11 }
  0x3c   : > { %642 = shalt.err (!%p639_p10)
}
  0x3d   : > { %s759_s8 = smov 128   ;;  %s760_s10 = smov 8  }
  0x3e   : > { %539 = dma.hbm_to_vmem [thread:$0]  (!%p865_p3), %s887_s4, 1024, %s891_s6, %s150_s7, %s759_s8, %s759_s8, %s760_s10  }
  0x3f   : > { %s929_s19 = scalar_lea.hbm %s1092_s2, %s516_s28  ;;  %s175_s20 = scalar_lea.vmem [#allocation7], %s492_s30 }
  0x40   : > { %s183_s22 = sshll.u32 %s175_s20, 4  ;;  %s172_s5 = scalar_lea.sflag [#allocation8], %s858_s27  ;;  %s933_s22 = int_to_ptr.vmem [resolvable:$true] %s183_s22 }
  0x41   : > { %s643_s9 = scalar_lea.hbm %s929_s19, 1024  ;;  %s648_s28 = scalar_lea.hbm %s1092_s2, 2048 }
  0x42   : > { %p644_p6 = scmp.ne.s32.totalorder %s929_s19, %s643_s9  ;;  %p649_p7 = scmp.lt.u32.totalorder %s929_s19, %s1092_s2 }
  0x43   : > { %p650_p2 = scmp.lt.u32.totalorder %s648_s28, %s643_s9  ;;  %p652_p5 = scmp.lt.u32.totalorder %s643_s9, %s929_s19 }
  0x44   : > { %p646_p11 = pnand %p644_p6, %p615_p1 }
  0x45   : > { %p651_p4 = por %p650_p2, %p649_p7 }
  0x46   : > { %p647_p12 = pneg %p646_p11 }
  0x47   : > { %p653_p0 = por %p652_p5, %p651_p4 }
  0x49   : > { %p654_p8 = pnand %p653_p0, %p647_p12 }
  0x4b   : > { %657 = shalt.err (!%p654_p8)
}
  0x4c   : > { %s658_s30 = scalar_lea.vmem %s933_s22, 1024  ;;  %s761_s17 = smov [#allocation7]  }
  0x4d   : > { %p659_p9 = scmp.ne.s32.totalorder %s933_s22, %s658_s30  ;;  %s663_s20 = sshll.u32 %s761_s17, 4  ;;  %s664_s20 = int_to_ptr.vmem [resolvable:$false] %s663_s20 }
  0x4e   : > { %s665_s4 = scalar_lea.vmem %s664_s20, 2048  ;;  %p666_p11 = scmp.lt.s32.totalorder %s933_s22, %s664_s20 }
  0x4f   : > { %p661_p10 = pnand %p659_p9, %p615_p1  ;;  %p667_p7 = scmp.lt.s32.totalorder %s665_s4, %s658_s30 }
  0x51   : > { %p662_p6 = pneg %p661_p10  ;;  %p668_p2 = por %p667_p7, %p666_p11 }
  0x53   : > { %p669_p4 = pnand %p668_p2, %p662_p6 }
  0x55   : > { %672 = shalt.err (!%p669_p4)
}
  0x56   : > { %542 = dma.hbm_to_vmem [thread:$0]  (!%p865_p3), %s929_s19, 1024, %s933_s22, %s172_s5, %s759_s8, %s759_s8, %s760_s10  }
  0x57   : > { %195 = sbr.rel (%p849_p13) target bundleno = 510 (0x1fe), region = 32  ;;  %p1104_p1 = scmp.eq.s32.totalorder (!%p849_p13), %s810_s16, 0 }
  0x5e   : > { %722 = dma.done.wait (%p1104_p1), [#allocation5], 16   ;;  %p1105_p12 = pmov %p1104_p1 }
  0x5f   : > { %s971_s29 = sand.u32 1, %s743_s13   ;;  %p1106_p3 = scmp.ne.s32.totalorder %s1098_s23, 0 }
  0x60   : > { %724 = vsyncadd (%p1105_p12), [#allocation5], 4294967280  ;;  %s502_s9 = sshll.u32 %s971_s29, 6  ;;  %s202_s27 = scalar_lea.sflag [#allocation3], %s971_s29 }
  0x61   : > { %s975_s6 = scalar_lea.vmem [#allocation6], %s502_s9 }
  0x62   : > { %726 = dma.done.wait (%p1106_p3), %s202_s27, 1024  }
  0x63   : > { %728 = vsyncadd (%p1106_p3), %s202_s27, 4294966272  ;;  %s211_s26 = scalar_lea.sflag [#allocation8], %s971_s29  ;;  %s982_s8 = scalar_lea.vmem [#allocation7], %s502_s9 }
  0x64   : > { %730 = dma.done.wait (%p1106_p3), %s211_s26, 1024  }
  0x65   : > { %732 = vsyncadd (%p1106_p3), %s211_s26, 4294966272 }
  0x66   : > { %219 = sfence }
  0x67   : > { %s504_s10 = sshll.u32 %s971_s29, 4  ;;  %s989_s19 = sld [smem:[#allocation2]]  ;;  %v250_v0 = vlaneseq }
  0x68   : > { %s991_s22 = sld [smem:[#allocation2 + $0x1]]  ;;  %s1004_s23 = scalar_lea.vmem [#allocation9], %s504_s10 }
  0x69   : > { %v993_v1 = vand.u32 127, %v250_v0  ;;  %v995_v2 = vshrl.u32 %v250_v0, 7  ;;  %s1006_s5 = smov 0  }
  0x6b   : > { %v998_v3 = vadd.s32 8, %v995_v2  ;;  %vm256_vm1 = vcmp.eq.s32.totalorder %v993_v1, 15  ;;  %vm257_vm2 = vcmp.eq.s32.totalorder %v995_v2, 0 }
  0x6d   : > { %vm260_vm3 = vcmp.eq.s32.totalorder %v998_v3, 15 }
  0x6e LB: >> { %s506_s28 = sshll.u32 %s755_s5, 4  ;;  %s762_s11 = smov 16   ;;  %vm274_vm4 = vcmask 1047680   ;;  %vm1107_vm0 = vcmp.eq.s32.totalorder %v993_v1, 0  ;;  %vm311_vm5 = vcmp.lt.s32.totalorder %v995_v2, 1  ;;  %vm316_vm6 = vcmp.lt.s32.totalorder %v995_v2, 7  ;;  %s755_s5 = sphi %s1006_s5, %s266_s5  }
  0x6f   : >> { %s268_s7 = scalar_lea.vmem %s975_s6, %s506_s28 [#allocation6]  ;;  %s763_s30 = smov 113   ;;  %v329_v34 = vstv %s991_s22  ;;  %v334_v40 = vstv %s989_s19  ;;  %v765_v44 = vmov 0  }
  0x70   : >> { %v269_v4 = vld [vmem:[%s268_s7] sm:$0xff]  ;;  %v270_v5 = vld [vmem:[%s268_s7 + $0x8] sm:$0xff]  ;;  %s764_s17 = smov 127   ;;  %s271_s20 = scalar_lea.vmem %s982_s8, %s506_s28 [#allocation7] }
  0x71   : >> { %275 = vrot.lane.b32.xlu0 %v269_v4, %s762_s11  ;;  %v272_v39 = vld [vmem:[%s271_s20] sm:$0xff]  ;;  %v273_v41 = vld [vmem:[%s271_s20 + $0x8] sm:$0xff]  ;;  %vm330_vm7 = vcmp.ge.f32.partialorder %v269_v4, %v329_v34  ;;  %vm331_vm8 = vcmp.ge.f32.partialorder %v270_v5, %v329_v34  ;;  %s519_s4 = sshll.u32 %s755_s5, 2  ;;  %s266_s5 = sadd.s32 1, %s755_s5  }
  0x72   : >> { %vm335_vm9 = vcmp.ge.f32.partialorder %v272_v39, %v334_v40  ;;  %vm336_vm12 = vcmp.ge.f32.partialorder %v273_v41, %v334_v40  ;;  %s350_s9 = scalar_lea.vmem %s1004_s23, %s519_s4 [#allocation9]  ;;  %p263_p13 = scmp.ge.s32.totalorder %s266_s5, 4  }
  0x73   : > { %s521_s27 = sshll.u32 (%p263_p13), %s810_s16, 8  ;;  %s369_s7 = sshll.u32 (%p263_p13), %s1004_s23, 4  ;;  %s1046_s7 = int_to_ptr.vmem [resolvable:$true] %s369_s7 }
  0x74   : > { %s1043_s28 = scalar_lea.hbm (%p263_p13), %s1093_s3, %s521_s27  ;;  %p1108_p0 = scmp.ne.s32.totalorder (%p263_p13), %s1099_s24, 0 }
  0x75   : >> { %278 = vrot.lane.b32.xlu0 %v270_v5, %s762_s11  ;;  %s766_s6 = smov (%p263_p13), [#allocation9]  }
  0x76   : > { %s677_s8 = sshll.u32 (%p263_p13), %s766_s6, 4  ;;  %s678_s8 = int_to_ptr.vmem [resolvable:$false] %s677_s8 }
  0x77   : > { %s679_s16 = scalar_lea.vmem (%p263_p13), %s678_s8, 512  ;;  %p680_p10 = scmp.lt.s32.totalorder (%p263_p13), %s1046_s7, %s678_s8 }
  0xe3   : >> { %v276_v6 = vpop.permute.xlu0 %275 }
  0xe4   : >> { %v277_v7 = vsel %vm274_vm4, %v276_v6, %v269_v4 }
  0xe5   : >> { %281 = vrot.lane.b32.xlu1 %v277_v7, %s762_s11 }
  0xe7   : >> { %v279_v8 = vpop.permute.xlu0 %278 }
  0xe8   : >> { %v280_v9 = vsel %vm274_vm4, %v279_v8, %v270_v5 }
  0xe9   : >> { %283 = vrot.lane.b32.xlu1 %v280_v9, %s762_s11  ;;  %s355_s11 = scalar_lea.sflag (%p263_p13), [#allocation4], %s971_s29 }
 0x157   : >> { %v282_v10 = vpop.permute.xlu1 %281 }
 0x158   : >> { %v285_v11 = vsel %vm274_vm4, %v282_v10, %v269_v4 }
 0x159   : >> { %289 = vrot.lane.b32.xlu0 %v285_v11, %s763_s30 }
 0x15b   : >> { %v284_v12 = vpop.permute.xlu1 %283 }
 0x15c   : >> { %v286_v13 = vsel %vm274_vm4, %v284_v12, %v270_v5 }
 0x15d   : >> { %297 = vrot.lane.b32.xlu0 %v285_v11, %s764_s17  ;;  %291 = vrot.lane.b32.xlu1 %v286_v13, %s763_s30  ;;  %s673_s30 = scalar_lea.vmem (%p263_p13), %s1046_s7, 256 }
 0x15e   : > { %p674_p5 = scmp.ne.s32.totalorder (%p263_p13), %s1046_s7, %s673_s30  ;;  %p681_p6 = scmp.lt.s32.totalorder (%p263_p13), %s679_s16, %s673_s30 }
 0x160   : > { %p675_p8 = pnand (%p263_p13), %p674_p5, %p1108_p0  ;;  %p682_p11 = por (%p263_p13), %p681_p6, %p680_p10 }
 0x161   : >> { %299 = vrot.lane.b32.xlu1 %v286_v13, %s764_s17 }
 0x162   : > { %p676_p9 = pneg (%p263_p13), %p675_p8 }
 0x164   : > { %p683_p7 = pnand (%p263_p13), %p682_p11, %p676_p9 }
 0x1cb   : >> { %v290_v14 = vpop.permute.xlu0 %289 }
 0x1cc   : >> { %v295_v17 = vsel %vm1107_vm0, -inf, %v290_v14 }
 0x1cf   : >> { %v292_v15 = vpop.permute.xlu1 %291  ;;  %v298_v16 = vpop.permute.xlu0 %297 }
 0x1d0   : >> { %v303_v18 = vsel %vm256_vm1, -inf, %v298_v16  ;;  %v296_v21 = vsel %vm1107_vm0, -inf, %v292_v15  ;;  %vm351_vm0 = vcmask 123904  }
 0x1d1   : >> { %v305_v19 = vmax.f32 %v295_v17, %v303_v18 }
 0x1d3   : >> { %v300_v20 = vpop.permute.xlu1 %299  ;;  %v307_v23 = vmax.f32 %v269_v4, %v305_v19 }
 0x1d4   : >> { %v304_v22 = vsel %vm256_vm1, -inf, %v300_v20 }
 0x1d5   : >> { %v306_v24 = vmax.f32 %v296_v21, %v304_v22  ;;  %v309_v26 = vrot.slane %v307_v23, 7  ;;  %v314_v27 = vrot.slane %v307_v23, 1 }
 0x1d7   : >> { %v308_v25 = vmax.f32 %v270_v5, %v306_v24 }
 0x1d9   : >> { %v310_v28 = vrot.slane %v308_v25, 7  ;;  %v315_v29 = vrot.slane %v308_v25, 1 }
 0x1db   : >> { %v312_v30 = vsel %vm311_vm5, %v309_v26, %v310_v28  ;;  %v313_v31 = vsel %vm311_vm5, %v310_v28, %v309_v26  ;;  %v317_v32 = vsel %vm316_vm6, %v314_v27, %v315_v29  ;;  %v318_v33 = vsel %vm316_vm6, %v315_v29, %v314_v27 }
 0x1dc   : >> { %v319_v35 = vsel %vm257_vm2, -inf, %v313_v31  ;;  %v322_v36 = vsel %vm260_vm3, -inf, %v318_v33 }
 0x1dd   : >> { %v323_v37 = vmax.f32 %v319_v35, %v317_v32  ;;  %v324_v38 = vmax.f32 %v312_v30, %v322_v36 }
 0x1df   : >> { %v325_v42 = vmax.f32 %v307_v23, %v323_v37  ;;  %v326_v43 = vmax.f32 %v308_v25, %v324_v38 }
 0x1e1   : >> { %vm327_vm10 = vcmp.eq.f32.partialorder %v269_v4, %v325_v42  ;;  %vm328_vm11 = vcmp.eq.f32.partialorder %v270_v5, %v326_v43 }
 0x1e2   : >> { %vm332_vm13 = vmand %vm327_vm10, %vm330_vm7 }
 0x1e3   : >> { %vm333_vm14 = vmand %vm328_vm11, %vm331_vm8 }
 0x1e4   : >> { %vm337_vm15 = vmand %vm332_vm13, %vm335_vm9 }
 0x1e5   : >> { %vm338_vm4 = vmand %vm333_vm14, %vm336_vm12 }
 0x1e6   : >> { %vm339_vm5 = vmpackc.low %vm338_vm4, %vm337_vm15 }
 0x1e7   : >> { %vm340_vm6 = vmpackc.even %vm339_vm5, %vm339_vm5 }
 0x1e8   : >> { %v341_v45 = vsel %vm340_vm6, 16843009, %v765_v44 }
 0x1e9   : >> { %v342_v46 = vunpack.c.0.s8 %v341_v45  ;;  %v343_v47 = vunpack.c.1.s8 %v341_v45  ;;  %265 = sbr.rel (!%p263_p13) target bundleno = 110 (0x6e), region = 105 }
 0x1eb   : >> { %v344_v48 = vpack.c.b16 %v342_v46, %v342_v46  ;;  %v346_v49 = vpack.c.b16 %v343_v47, %v343_v47 }
 0x1ed   : >> { %v345_v50 = vpack.c.b8 %v344_v48, %v344_v48  ;;  %v347_v51 = vpack.c.b8 %v346_v49, %v346_v49 }
 0x1ef   : >> { %352 = vst.msk [vmem:[%s350_s9] sm:$0x3] %vm351_vm0, %v345_v50  ;;  %353 = vst.msk [vmem:[%s350_s9 + $0x2] sm:$0x3] %vm351_vm0, %v347_v51 }
 0x1f0   : > { %686 = shalt.err (!%p683_p7)
}
 0x1f1   : > { %s687_s19 = scalar_lea.hbm %s1043_s28, 256  ;;  %s691_s5 = scalar_lea.hbm %s1093_s3, 512 }
 0x1f2   : > { %p688_p2 = scmp.ne.s32.totalorder %s1043_s28, %s687_s19  ;;  %p692_p12 = scmp.lt.u32.totalorder %s1043_s28, %s1093_s3 }
 0x1f3   : > { %p693_p3 = scmp.lt.u32.totalorder %s691_s5, %s687_s19  ;;  %p695_p5 = scmp.lt.u32.totalorder %s687_s19, %s1043_s28 }
 0x1f4   : > { %p689_p4 = pnand %p688_p2, %p1108_p0 }
 0x1f5   : > { %p694_p13 = por %p693_p3, %p692_p12 }
 0x1f6   : > { %p690_p1 = pneg %p689_p4 }
 0x1f7   : > { %p696_p8 = por %p695_p5, %p694_p13 }
 0x1f9   : > { %p697_p9 = pnand %p696_p8, %p690_p1 }
 0x1fb   : > { %700 = shalt.err (!%p697_p9)
}
 0x1fc   : > { %s767_s4 = smov 32   ;;  %s768_s9 = smov 2  }
 0x1fd   : > { %530 = dma.vmem_to_hbm [thread:$0]  (%p1108_p0), %s1046_s7, 256, %s1043_s28, %s355_s11, %s767_s4, %s767_s4, %s768_s9  }
 0x1fe PF: > { %s384_s27 = sand.u32 1, %s739_s12   ;;  %p1109_p10 = scmp.ne.s32.totalorder %s1100_s25, 0 }
 0x1ff   : > { %p1110_p6 = scmp.ge.s32.totalorder %s751_s15, 2  ;;  %s385_s26 = scalar_lea.sflag [#allocation4], %s384_s27 }
 0x201   : > { %p544_p11 = pnand %p1110_p6, %p1109_p10 }
 0x203   : > { %734 = dma.done.wait (!%p544_p11), %s385_s26, 256  }
 0x204   : > { %736 = vsyncadd (!%p544_p11), %s385_s26, 4294967040  ;;  %p20_p7 = scmp.ge.s32.totalorder %s814_s18, 4   ;;  %s1111_s12 = smov %s743_s13 }
 0x205   : > { %s1112_s13 = smov %s747_s14  ;;  %s1113_s14 = smov %s826_s21 }
 0x206   : > { %s1114_s15 = smov %s814_s18  ;;  %22 = sbr.rel (!%p20_p7) target bundleno = 8 (0x8), region = 116 }
 0x20d   :  { %390 = vsyncpa [#allocation3], 1 }
 0x20e   :  { %392 = vsyncpa [#allocation3 + $0x1], 1 }
 0x20f   :  { %393 = vsyncpa [#allocation8], 1 }
 0x210   :  { %395 = vsyncpa [#allocation8 + $0x1], 1 }
 0x211   :  { %396 = vsyncpa [#allocation4], 1 }
 0x212   :  { %398 = vsyncpa [#allocation4 + $0x1], 1 }
 0x213   :  { %399 = vsyncpa [#allocation5], 1 }
 0x214   :  { %401 = vsyncpa [#allocation5 + $0x1], 1 }

</bundles_post_ra>
